<compile_context>
chip_gen: v5e
topology: v5e:2x2
jax: 0.10.0
libtpu: 0.0.40
codegen_flags: <defaults>
</compile_context>

<pallas_src>
import math

import jax
import jax.numpy as jnp
from jax.experimental import pallas as pl
from jax.experimental.pallas import tpu as pltpu


def _vmem_capacity_bytes():
    """Per-core VMEM capacity; conservative default if the query fails."""
    try:
        return int(pltpu.get_tpu_info().vmem_capacity_bytes)
    except Exception:
        return 64 << 20  # v7x-per-TC sized default: safe on every generation


def _generation_budget():
    """(target f32 tile bytes, vmem_limit cap) tuned per TPU generation."""
    vmem = _vmem_capacity_bytes()
    if vmem >= (100 << 20):          # v5e / v6e: 128 MiB VMEM per core
        return 8 << 20, 64 << 20
    return 4 << 20, 40 << 20         # v7x: 64 MiB VMEM per TensorCore


def _pick_tile(extent, features, quantum, target_f32_bytes, cap):
    """Pick the tile along the row/vector axis.

    Sized by a byte budget (HBM-bound kernel -> big double-buffered blocks
    amortize the ~0.35us/step grid overhead).  If the whole extent fits in one
    tile, use the full extent (always a legal block shape)."""
    tile = target_f32_bytes // max(1, features * 4)
    tile = max(quantum, (tile // quantum) * quantum)
    tile = min(tile, cap)
    if extent <= tile:
        return extent
    return tile


def _make_kernel(eps, inv_f, has_bias, axis):
    """LayerNorm kernel body; `axis` is the reduction axis of the x block.

    Two-pass statistics: mean, then sum((x - mean)^2).  The extra pass runs on
    data already resident in VMEM with large VPU/XLU slack, so it costs
    nothing in this memory-bound regime and is numerically robust."""

    def kernel(*refs):
        if has_bias:
            x_ref, g_ref, b_ref, o_ref = refs
        else:
            x_ref, g_ref, o_ref = refs
            b_ref = None
        x = x_ref[...].astype(jnp.float32)
        mean = jnp.sum(x, axis=axis, keepdims=True) * inv_f
        xc = x - mean
        var = jnp.sum(xc * xc, axis=axis, keepdims=True) * inv_f
        inv = jax.lax.rsqrt(var + eps)
        out = xc * inv * g_ref[...]                   # g/b already f32
        if has_bias:
            out = out + b_ref[...]
        o_ref[...] = out.astype(o_ref.dtype)

    return kernel


def layer_norm(x, g, b=None, *, eps=1e-5):
    """LayerNorm over the last axis of x, matching the PyTorch module."""
    orig_shape = x.shape
    features = orig_shape[-1]
    rows = int(math.prod(orig_shape[:-1]))            # 1 for 1-D inputs
    rows = max(rows, 1)
    x2 = x.reshape(rows, features)

    has_bias = b is not None
    itemsize = jnp.dtype(x.dtype).itemsize
    target_f32_bytes, vmem_cap = _generation_budget()
    inv_f = 1.0 / float(features)
    eps = float(eps)

    g_f32 = g.reshape(-1).astype(jnp.float32)
    b_f32 = b.reshape(-1).astype(jnp.float32) if has_bias else None

    # Layout choice:
    #   F >= 128: keep (rows, F) with F on lanes (already lane-dense).
    #   F <  128: transpose so rows map to lanes and F to sublanes (reduce over
    #   sublanes).  The wrapper-side transpose is pure layout plumbing; it buys
    #   up to 128/F x denser DMA/stores inside the kernel.
    lane_dense_transpose = features < 128

    if lane_dense_transpose:
        x_in = x2.T                                   # (F, rows): rows on lanes
        g_in = g_f32.reshape(features, 1)
        b_in = b_f32.reshape(features, 1) if has_bias else None
        tile = _pick_tile(rows, features, 128, target_f32_bytes, 1 << 16)
        block = (features, tile)
        x_map = lambda i: (0, i)
        p_block = (features, 1)
        out_shape = jax.ShapeDtypeStruct((features, rows), x.dtype)
        reduce_axis = 0
    else:
        x_in = x2
        g_in = g_f32.reshape(1, features)
        b_in = b_f32.reshape(1, features) if has_bias else None
        quantum = max(8, 32 // itemsize)              # sublane quantum per dtype
        tile = _pick_tile(rows, features, quantum, target_f32_bytes, 8192)
        block = (tile, features)
        x_map = lambda i: (i, 0)
        p_block = (1, features)
        out_shape = jax.ShapeDtypeStruct((rows, features), x.dtype)
        reduce_axis = -1

    grid = (pl.cdiv(rows, tile),)

    # VMEM budget: double-buffered in/out blocks + ~3 full-tile f32
    # temporaries + headroom for Mosaic internal scratch, clamped to the
    # generation-aware cap (64 MiB on v5e/v6e, 40 MiB on v7x's 64 MiB VMEM).
    tile_elems = block[0] * block[1]
    need = 4 * tile_elems * itemsize + 3 * tile_elems * 4 + (4 << 20)
    vmem_limit = int(min(max(need, 32 << 20), vmem_cap))

    kernel = _make_kernel(eps, inv_f, has_bias, reduce_axis)

    param_spec = pl.BlockSpec(p_block, lambda i: (0, 0))
    in_specs = [pl.BlockSpec(block, x_map), param_spec]
    args = [x_in, g_in]
    if has_bias:
        in_specs.append(param_spec)
        args.append(b_in)

    out = pl.pallas_call(
        kernel,
        out_shape=out_shape,
        grid_spec=pltpu.PrefetchScalarGridSpec(
            num_scalar_prefetch=0,
            grid=grid,
            in_specs=in_specs,
            out_specs=pl.BlockSpec(block, x_map),
        ),
        compiler_params=pltpu.CompilerParams(
            # "parallel" lets Mosaic shard the row grid across TensorCores on
            # multi-TC chips (v7x); it is a no-op on single-TC v5e/v6e.
            dimension_semantics=("parallel",),
            vmem_limit_bytes=vmem_limit,
        ),
    )(*args)

    if lane_dense_transpose:
        out = out.T
    return out.reshape(orig_shape)


def reference_layer_norm(x, g, b, eps=1e-5):
    xf = x.astype(jnp.float32)
    mean = jnp.mean(xf, axis=-1, keepdims=True)
    var = jnp.mean(jnp.square(xf - mean), axis=-1, keepdims=True)
    norm = (xf - mean) * jax.lax.rsqrt(var + eps) * g
    if b is not None:
        norm = norm + b
    return norm.astype(x.dtype)


if __name__ == "__main__":
    key = jax.random.PRNGKey(0)

    # Small shapes consistent with the module's use on (batch, seq, features).
    batch, seq, features = 2, 8, 32
    x = jax.random.normal(key, (batch, seq, features), dtype=jnp.float32)
    # Deterministic parameter init per nn.Module.__init__: g=ones, b=zeros.
    g = jnp.ones((features,), dtype=jnp.float32)
    b = jnp.zeros((features,), dtype=jnp.float32)

    out = jax.block_until_ready(layer_norm(x, g, b, eps=1e-5))
    ref = reference_layer_norm(x, g, b, eps=1e-5)
    assert out.shape == x.shape
    assert jnp.allclose(out, ref, atol=3e-5, rtol=1e-5)

    # No-bias path (bias=False in the PyTorch module): bias input is dropped.
    out_nb = jax.block_until_ready(layer_norm(x, g, None, eps=1e-5))
    ref_nb = reference_layer_norm(x, g, None, eps=1e-5)
    assert jnp.allclose(out_nb, ref_nb, atol=3e-5, rtol=1e-5)

    # Lane-dense (F >= 128) row-layout path.
    features2 = 128
    key2 = jax.random.PRNGKey(0)
    x2 = 10.0 + jax.random.normal(key2, (batch, seq, features2), dtype=jnp.float32)
    g2 = jnp.ones((features2,), dtype=jnp.float32)
    b2 = jnp.zeros((features2,), dtype=jnp.float32)
    out2 = jax.block_until_ready(layer_norm(x2, g2, b2, eps=1e-5))
    ref2 = reference_layer_norm(x2, g2, b2, eps=1e-5)
    assert jnp.allclose(out2, ref2, atol=3e-5, rtol=1e-5)

    print("KERNEL_OK")
</pallas_src>

<mosaic_0001>
module attributes {stable_mosaic.version = 11 : i64} {
  func.func @kernel(%arg0: i32, %arg1: memref<32x16xf32, #tpu.memory_space<vmem>>, %arg2: memref<32x1xf32, #tpu.memory_space<vmem>>, %arg3: memref<32x1xf32, #tpu.memory_space<vmem>>, %arg4: memref<32x16xf32, #tpu.memory_space<vmem>>) attributes {dimension_semantics = [#tpu.dimension_semantics<parallel>], iteration_bounds = array<i64: 1>, scalar_prefetch = 0 : i64, scratch_operands = 0 : i64, tpu.core_type = #tpu.core_type<tc>, window_params = [{transform_indices = @transform_0, window_bounds = array<i64: 32, 16>}, {pipeline_mode = #tpu.pipeline_mode<synchronous>, transform_indices = @transform_1, window_bounds = array<i64: 32, 1>}, {pipeline_mode = #tpu.pipeline_mode<synchronous>, transform_indices = @transform_2, window_bounds = array<i64: 32, 1>}, {transform_indices = @transform_3, window_bounds = array<i64: 32, 16>}]} {
    %c0 = arith.constant 0 : index
    %c0_0 = arith.constant 0 : index
    %0 = vector.load %arg1[%c0, %c0_0] : memref<32x16xf32, #tpu.memory_space<vmem>>, vector<32x16xf32>
    %cst = arith.constant dense<0.000000e+00> : vector<16xf32>
    %1 = vector.multi_reduction <add>, %0, %cst [0] : vector<32x16xf32> to vector<16xf32>
    %2 = vector.shape_cast %1 : vector<16xf32> to vector<1x16xf32>
    %cst_1 = arith.constant 3.125000e-02 : f32
    %3 = vector.broadcast %cst_1 : f32 to vector<1x16xf32>
    %4 = arith.mulf %2, %3 : vector<1x16xf32>
    %5 = vector.broadcast %4 : vector<1x16xf32> to vector<32x16xf32>
    %6 = arith.subf %0, %5 : vector<32x16xf32>
    %7 = arith.mulf %6, %6 : vector<32x16xf32>
    %cst_2 = arith.constant dense<0.000000e+00> : vector<16xf32>
    %8 = vector.multi_reduction <add>, %7, %cst_2 [0] : vector<32x16xf32> to vector<16xf32>
    %9 = vector.shape_cast %8 : vector<16xf32> to vector<1x16xf32>
    %cst_3 = arith.constant 3.125000e-02 : f32
    %10 = vector.broadcast %cst_3 : f32 to vector<1x16xf32>
    %11 = arith.mulf %9, %10 : vector<1x16xf32>
    %cst_4 = arith.constant 9.99999974E-6 : f32
    %12 = vector.broadcast %cst_4 : f32 to vector<1x16xf32>
    %13 = arith.addf %11, %12 : vector<1x16xf32>
    %14 = math.rsqrt %13 : vector<1x16xf32>
    %15 = vector.broadcast %14 : vector<1x16xf32> to vector<32x16xf32>
    %16 = arith.mulf %6, %15 : vector<32x16xf32>
    %c0_5 = arith.constant 0 : index
    %c0_6 = arith.constant 0 : index
    %17 = vector.load %arg2[%c0_5, %c0_6] : memref<32x1xf32, #tpu.memory_space<vmem>>, vector<32x1xf32>
    %18 = vector.broadcast %17 : vector<32x1xf32> to vector<32x16xf32>
    %19 = arith.mulf %16, %18 : vector<32x16xf32>
    %c0_7 = arith.constant 0 : index
    %c0_8 = arith.constant 0 : index
    %20 = vector.load %arg3[%c0_7, %c0_8] : memref<32x1xf32, #tpu.memory_space<vmem>>, vector<32x1xf32>
    %21 = vector.broadcast %20 : vector<32x1xf32> to vector<32x16xf32>
    %22 = arith.addf %19, %21 : vector<32x16xf32>
    %c0_9 = arith.constant 0 : index
    %c0_10 = arith.constant 0 : index
    %23 = vector.load %arg4[%c0_9, %c0_10] : memref<32x16xf32, #tpu.memory_space<vmem>>, vector<32x16xf32>
    tpu.vector_store %arg4[%c0_9, %c0_10], %22 {strides = array<i32>} : memref<32x16xf32, #tpu.memory_space<vmem>>, vector<32x16xf32>,
    return
  }
  func.func @transform_0(%arg0: i32) -> (i32, i32) {
    %c0_i32 = arith.constant 0 : i32
    %c0_i32_0 = arith.constant 0 : i32
    return %c0_i32, %arg0 : i32, i32
  }
  func.func @transform_1(%arg0: i32) -> (i32, i32) {
    %c0_i32 = arith.constant 0 : i32
    %c0_i32_0 = arith.constant 0 : i32
    %c0_i32_1 = arith.constant 0 : i32
    return %c0_i32, %c0_i32_0 : i32, i32
  }
  func.func @transform_2(%arg0: i32) -> (i32, i32) {
    %c0_i32 = arith.constant 0 : i32
    %c0_i32_0 = arith.constant 0 : i32
    %c0_i32_1 = arith.constant 0 : i32
    return %c0_i32, %c0_i32_0 : i32, i32
  }
  func.func @transform_3(%arg0: i32) -> (i32, i32) {
    %c0_i32 = arith.constant 0 : i32
    %c0_i32_0 = arith.constant 0 : i32
    return %c0_i32, %arg0 : i32, i32
  }
}

</mosaic_0001>

<bundles_post_ra>
// kernel: tpu_custom_call.1
= control target key start
LH: loop header
LB: loop body
LE: loop exit
PB: predicated region body
PF: predicated region fallthrough
CT: control target
= control target key end

     0   :  { %v140_v0 = vmov 0   ;;  %vm18_vm0 = vcmask 130048   ;;  %s221_s1 = inlined_call_operand.vmem [shape: f32[32,1], index: 1, kind: input, shape index: {}]   ;;  %s222_s2 = inlined_call_operand.vmem [shape: f32[32,1], index: 2, kind: input, shape index: {}]   ;;  %s223_s0 = inlined_call_operand.vmem [shape: f32[32,16], index: 0, kind: input, shape index: {}]   ;;  %s224_s3 = inlined_call_operand.vmem [shape: f32[32,16], index: 3, kind: output, shape index: {}]  }
   0x1   :  { %136 = vset.pattern.permute.xlu1 %v140_v0  ;;  %135 = vset.pattern.permute.xlu0 %v140_v0  ;;  %v72_v1 = vld [vmem:[%s221_s1 + $0x10] sm:$0xff]  ;;  %v70_v2 = vld [vmem:[%s221_s1] sm:$0xff]  ;;  %v73_v4 = vld [vmem:[%s221_s1 + $0x18] sm:$0xff] }
   0x2   :  { %86 = vperm.xlu1 %136, %v72_v1   ;;  %76 = vperm.xlu0 %135, %v70_v2   ;;  %v98_v3 = vld [vmem:[%s222_s2] sm:$0xff]  ;;  %v71_v5 = vld [vmem:[%s221_s1 + $0x8] sm:$0xff]  ;;  %v101_v7 = vld [vmem:[%s222_s2 + $0x18] sm:$0xff] }
   0x3   :  { %137 = vset.pattern.permute.xlu2 %v140_v0  ;;  %v99_v6 = vld [vmem:[%s222_s2 + $0x8] sm:$0xff]  ;;  %v100_v8 = vld [vmem:[%s222_s2 + $0x10] sm:$0xff]  ;;  %v14_v9 = vld [vmem:[%s223_s0] sm:$0xff] }
   0x4   :  { %104 = vperm.xlu2 %137, %v98_v3   ;;  %v15_v10 = vld [vmem:[%s223_s0 + $0x8] sm:$0xff]  ;;  %v19_v11 = vsel %vm18_vm0, %v14_v9, 0.0  ;;  %v16_v13 = vld [vmem:[%s223_s0 + $0x10] sm:$0xff]  ;;  %v17_v16 = vld [vmem:[%s223_s0 + $0x18] sm:$0xff] }
   0x5   :  { %v20_v12 = vsel %vm18_vm0, %v15_v10, 0.0  ;;  %v22_v15 = vsel %vm18_vm0, %v16_v13, 0.0  ;;  %v24_v18 = vsel %vm18_vm0, %v17_v16, 0.0 }
   0x6   :  { %v21_v14 = vadd.f32 %v20_v12, %v19_v11 }
   0x8   :  { %v23_v17 = vadd.f32 %v22_v15, %v21_v14 }
   0xa   :  { %91 = vperm.xlu1 %136, %v73_v4   ;;  %81 = vperm.xlu0 %135, %v71_v5   ;;  %v25_v19 = vadd.f32 %v24_v18, %v23_v17 }
   0xc   :  { %109 = vperm.xlu2 %137, %v99_v6   ;;  %v26_v20 = vrot.slane %v25_v19, 4 }
   0xe   :  { %v27_v21 = vadd.f32 %v26_v20, %v25_v19 }
  0x10   :  { %v28_v22 = vrot.slane %v27_v21, 2 }
  0x12   :  { %119 = vperm.xlu1 %136, %v101_v7   ;;  %114 = vperm.xlu0 %135, %v100_v8   ;;  %v29_v23 = vadd.f32 %v28_v22, %v27_v21 }
  0x14   :  { %v30_v24 = vrot.slane %v29_v23, 1 }
  0x16   :  { %v31_v25 = vadd.f32 %v30_v24, %v29_v23 }
  0x18   :  { %v32_v26 = vmul.f32 0.03125, %v31_v25 }
  0x1a   :  { %v33_v27 = vsub.f32 %v14_v9, %v32_v26  ;;  %v34_v28 = vsub.f32 %v15_v10, %v32_v26  ;;  %v35_v29 = vsub.f32 %v16_v13, %v32_v26  ;;  %v36_v32 = vsub.f32 %v17_v16, %v32_v26 }
  0x1c   :  { %v37_v30 = vmul.f32 %v33_v27, %v33_v27  ;;  %v38_v31 = vmul.f32 %v34_v28, %v34_v28  ;;  %v39_v33 = vmul.f32 %v35_v29, %v35_v29  ;;  %v40_v37 = vmul.f32 %v36_v32, %v36_v32 }
  0x1e   :  { %v41_v34 = vsel %vm18_vm0, %v37_v30, 0.0  ;;  %v42_v35 = vsel %vm18_vm0, %v38_v31, 0.0  ;;  %v44_v38 = vsel %vm18_vm0, %v39_v33, 0.0  ;;  %v46_v40 = vsel %vm18_vm0, %v40_v37, 0.0 }
  0x1f   :  { %v43_v36 = vadd.f32 %v42_v35, %v41_v34 }
  0x21   :  { %v45_v39 = vadd.f32 %v44_v38, %v43_v36 }
  0x23   :  { %v47_v41 = vadd.f32 %v46_v40, %v45_v39 }
  0x25   :  { %v48_v42 = vrot.slane %v47_v41, 4 }
  0x27   :  { %v49_v43 = vadd.f32 %v48_v42, %v47_v41 }
  0x29   :  { %v50_v44 = vrot.slane %v49_v43, 2 }
  0x2b   :  { %v51_v45 = vadd.f32 %v50_v44, %v49_v43 }
  0x2d   :  { %v52_v46 = vrot.slane %v51_v45, 1 }
  0x2f   :  { %v53_v47 = vadd.f32 %v52_v46, %v51_v45 }
  0x31   :  { %v54_v48 = vmul.f32 0.03125, %v53_v47 }
  0x33   :  { %v55_v49 = vadd.f32 1e-05, %v54_v48 }
  0x35   :  { %138 = vrsqrt.f32 %v55_v49  ;;  %vm62_vm1 = vweird.f32 %v55_v49 }
  0x3b   :  { %v139_v50 = vpop.eup %138 }
  0x3c   :  { %v57_v51 = vmul.f32 %v139_v50, %v55_v49  ;;  %vm63_vm2 = vweird.f32 %v139_v50 }
  0x3d   :  { %vm64_vm3 = vmor %vm62_vm1, %vm63_vm2 }
  0x3e   :  { %v58_v52 = vmul.f32 %v139_v50, %v57_v51 }
  0x40   :  { %v59_v53 = vmul.f32 0.5, %v58_v52 }
  0x42   :  { %v60_v54 = vsub.f32 1.5, %v59_v53 }
  0x44   :  { %v61_v55 = vmul.f32 %v139_v50, %v60_v54 }
  0x46   :  { %v65_v56 = vsel %vm64_vm3, %v139_v50, %v61_v55 }
  0x47   :  { %v66_v57 = vmul.f32 %v65_v56, %v33_v27  ;;  %v67_v63 = vmul.f32 %v65_v56, %v34_v28  ;;  %v68_v4 = vmul.f32 %v65_v56, %v35_v29  ;;  %v69_v5 = vmul.f32 %v65_v56, %v36_v32 }
  0x5e   :  { %v105_v58 = vpop.permute.xlu2 %104 }
  0x66   :  { %v110_v3 = vpop.permute.xlu2 %109 }
  0x74   :  { %v87_v59 = vpop.permute.xlu1 %86  ;;  %v77_v60 = vpop.permute.xlu0 %76 }
  0x75   :  { %v94_v61 = vmul.f32 %v77_v60, %v66_v57  ;;  %v96_v7 = vmul.f32 %v87_v59, %v68_v4 }
  0x77   :  { %v122_v62 = vadd.f32 %v105_v58, %v94_v61 }
  0x79   :  { %126 = vst.msk [vmem:[%s224_s3] sm:$0xff] %vm18_vm0, %v122_v62 }
  0x7c   :  { %v92_v0 = vpop.permute.xlu1 %91  ;;  %v82_v1 = vpop.permute.xlu0 %81 }
  0x7d   :  { %v95_v2 = vmul.f32 %v82_v1, %v67_v63  ;;  %v97_v8 = vmul.f32 %v92_v0, %v69_v5 }
  0x7f   :  { %v123_v6 = vadd.f32 %v110_v3, %v95_v2 }
  0x81   :  { %127 = vst.msk [vmem:[%s224_s3 + $0x8] sm:$0xff] %vm18_vm0, %v123_v6 }
  0x84   :  { %v120_v9 = vpop.permute.xlu1 %119  ;;  %v115_v10 = vpop.permute.xlu0 %114 }
  0x85   :  { %v125_v11 = vadd.f32 %v120_v9, %v97_v8  ;;  %v124_v12 = vadd.f32 %v115_v10, %v96_v7 }
  0x87   :  { %129 = vst.msk [vmem:[%s224_s3 + $0x18] sm:$0xff] %vm18_vm0, %v125_v11 }
  0x88   :  { %128 = vst.msk [vmem:[%s224_s3 + $0x10] sm:$0xff] %vm18_vm0, %v124_v12 }

</bundles_post_ra>
